<compile_context>
chip_gen: v7x
topology: tpu7x:2x2x1
jax: 0.10.0
libtpu: 0.0.40
codegen_flags: <defaults>
</compile_context>

<pallas_src>
import functools

import jax
import jax.numpy as jnp
from jax.experimental import pallas as pl
from jax.experimental.pallas import tpu as pltpu


def _convlstm_kernel(cols_ref, w_ref, b_ref, c_ref, h_out_ref, c_out_ref):
    """One (batch, pixel-tile) per grid step.

    cols_ref:  (K, TW)        bf16 im2col columns (K = KH*KW*C_comb)
    w_ref:     (4*C_hid, K)   bf16 folded conv weight
    b_ref:     (4*C_hid, 1)   f32 bias
    c_ref:     (C_hid, TW)    current cell state
    outputs:   (C_hid, TW)    h_next / c_next
    """
    C_hid = c_ref.shape[0]

    # Conv2d('same') for this pixel tile as a single MXU matmul, f32 accum.
    acc = jnp.dot(w_ref[...], cols_ref[...],
                  preferred_element_type=jnp.float32)        # (4*C_hid, TW)
    acc = acc + b_ref[...]                                    # bias broadcast

    # Gate math in f32 on the dense matmul-output layout; slice offsets are
    # multiples of 8 (sublane aligned) since C_hid = 32.
    i = jax.nn.sigmoid(acc[0 * C_hid:1 * C_hid, :])
    f = jax.nn.sigmoid(acc[1 * C_hid:2 * C_hid, :])
    o = jax.nn.sigmoid(acc[2 * C_hid:3 * C_hid, :])
    g = jnp.tanh(acc[3 * C_hid:4 * C_hid, :])

    c_cur = c_ref[...].astype(jnp.float32)
    c_next = f * c_cur + i * g
    h_next = o * jnp.tanh(c_next)

    # Lane-dense, unmasked stores (TW is a multiple of 128 or the full dim).
    h_out_ref[...] = h_next.astype(h_out_ref.dtype)
    c_out_ref[...] = c_next.astype(c_out_ref.dtype)


def _pick_tile(hw, tile_pixels):
    """Largest lane-aligned tile that evenly divides HW, else the full image."""
    for cand in (tile_pixels, 512, 256, 128):
        if cand is None:
            continue
        if cand % 128 == 0 and hw % cand == 0:
            return cand
    return hw


@functools.partial(jax.jit, static_argnames=("kernel_size", "tile_pixels"))
def conv_lstm_cell(x_nchw, h_nchw, c_nchw, weight_oihw, bias_o, kernel_size,
                   tile_pixels=256):
    """ConvLSTMCell.forward.  Inputs/outputs follow the PyTorch NCHW layout."""
    KH, KW = kernel_size
    ph, pw = KH // 2, KW // 2          # 'same' padding (odd kernels, as in the module)
    B, C_in, H, W = x_nchw.shape
    C_hid = h_nchw.shape[1]
    C_comb = C_in + C_hid
    K = KH * KW * C_comb
    HW = H * W

    TW = _pick_tile(HW, tile_pixels)
    n_sp = HW // TW

    # Full im2col directly from NCHW (no activation transposes needed):
    # cols[b, (ki*KW+kj)*C_comb + ci, y*W + x] = combined[b, ci, y+ki-ph, x+kj-pw]
    comb = jnp.concatenate([x_nchw, h_nchw], axis=1).astype(jnp.bfloat16)
    comb_pad = jnp.pad(comb, ((0, 0), (0, 0), (ph, ph), (pw, pw)))
    cols = jnp.concatenate(
        [comb_pad[:, :, ki:ki + H, kj:kj + W].reshape(B, C_comb, HW)
         for ki in range(KH) for kj in range(KW)], axis=1)       # (B, K, HW)

    # OIHW -> (O, KH, KW, I) -> (O, K): matches the im2col channel ordering.
    w = jnp.transpose(weight_oihw, (0, 2, 3, 1)).reshape(4 * C_hid, K)
    w = w.astype(jnp.bfloat16)
    b = bias_o.reshape(4 * C_hid, 1).astype(jnp.float32)

    # Cell state in (B, C_hid, HW): a free reshape of NCHW, lane-dense blocks.
    c = c_nchw.reshape(B, C_hid, HW)

    out_shape = (jax.ShapeDtypeStruct((B, C_hid, HW), h_nchw.dtype),
                 jax.ShapeDtypeStruct((B, C_hid, HW), c_nchw.dtype))

    h2d, c2d = pl.pallas_call(
        _convlstm_kernel,
        out_shape=out_shape,
        grid_spec=pltpu.PrefetchScalarGridSpec(
            num_scalar_prefetch=0,
            grid=(B, n_sp),
            in_specs=[
                # Leading batch dim squeezed: kernel sees 2-D tiles.
                pl.BlockSpec((None, K, TW), lambda bb, tt: (bb, 0, tt)),
                pl.BlockSpec((4 * C_hid, K), lambda bb, tt: (0, 0)),
                pl.BlockSpec((4 * C_hid, 1), lambda bb, tt: (0, 0)),
                pl.BlockSpec((None, C_hid, TW), lambda bb, tt: (bb, 0, tt)),
            ],
            out_specs=[
                pl.BlockSpec((None, C_hid, TW), lambda bb, tt: (bb, 0, tt)),
                pl.BlockSpec((None, C_hid, TW), lambda bb, tt: (bb, 0, tt)),
            ],
        ),
        compiler_params=pltpu.CompilerParams(
            dimension_semantics=("parallel", "parallel"),
            vmem_limit_bytes=32 * 1024 * 1024),
    )(cols, w, b, c)

    # (B, C_hid, HW) -> NCHW (free reshape).
    h_next = h2d.reshape(B, C_hid, H, W)
    c_next = c2d.reshape(B, C_hid, H, W)
    return h_next, c_next


def _reference(x_nchw, h_nchw, c_nchw, weight_oihw, bias_o, kernel_size):
    """Pure-JAX f32 reference mirroring the PyTorch module exactly (NCHW)."""
    KH, KW = kernel_size
    ph, pw = KH // 2, KW // 2
    C_hid = h_nchw.shape[1]
    combined = jnp.concatenate([x_nchw, h_nchw], axis=1)
    conv = jax.lax.conv_general_dilated(
        combined, weight_oihw, window_strides=(1, 1),
        padding=((ph, ph), (pw, pw)),
        dimension_numbers=("NCHW", "OIHW", "NCHW"))
    conv = conv + bias_o[None, :, None, None]
    cc_i = conv[:, 0 * C_hid:1 * C_hid]
    cc_f = conv[:, 1 * C_hid:2 * C_hid]
    cc_o = conv[:, 2 * C_hid:3 * C_hid]
    cc_g = conv[:, 3 * C_hid:4 * C_hid]
    i = jax.nn.sigmoid(cc_i)
    f = jax.nn.sigmoid(cc_f)
    o = jax.nn.sigmoid(cc_o)
    g = jnp.tanh(cc_g)
    c_next = f * c_nchw + i * g
    h_next = o * jnp.tanh(c_next)
    return h_next, c_next


if __name__ == "__main__":
    # ConvLSTMCell(input_dim=4, hidden_dim=32, kernel_size=(3,3), bias=True)
    B, C_in, C_hid, H, W = 2, 4, 32, 16, 16
    kernel_size = (3, 3)
    C_comb = C_in + C_hid

    key = jax.random.PRNGKey(0)
    kx, kh, kc, kw_, kb = jax.random.split(key, 5)
    x = jax.random.normal(kx, (B, C_in, H, W), jnp.float32)
    h_cur = jax.random.normal(kh, (B, C_hid, H, W), jnp.float32)
    c_cur = jax.random.normal(kc, (B, C_hid, H, W), jnp.float32)
    # Conv2d weight: (out=4*C_hid, in=C_in+C_hid, KH, KW), bias: (4*C_hid,)
    weight = 0.1 * jax.random.normal(
        kw_, (4 * C_hid, C_comb, kernel_size[0], kernel_size[1]), jnp.float32)
    bias = 0.1 * jax.random.normal(kb, (4 * C_hid,), jnp.float32)

    h_next, c_next = conv_lstm_cell(x, h_cur, c_cur, weight, bias, kernel_size)
    h_next, c_next = jax.block_until_ready((h_next, c_next))

    h_want, c_want = _reference(x, h_cur, c_cur, weight, bias, kernel_size)
    assert h_next.shape == (B, C_hid, H, W) and c_next.shape == (B, C_hid, H, W)
    # bf16 matmul operands (f32 accumulate) -> relaxed tolerance vs f32 reference.
    assert jnp.allclose(h_next, h_want, atol=5e-2, rtol=5e-2)
    assert jnp.allclose(c_next, c_want, atol=5e-2, rtol=5e-2)
    print("KERNEL_OK")
</pallas_src>

<mosaic_0001>
module attributes {stable_mosaic.version = 11 : i64} {
  func.func @_convlstm_kernel(%arg0: i32, %arg1: i32, %arg2: memref<1x324x256xbf16, #tpu.memory_space<vmem>>, %arg3: memref<128x324xbf16, #tpu.memory_space<vmem>>, %arg4: memref<128x1xf32, #tpu.memory_space<vmem>>, %arg5: memref<1x32x256xf32, #tpu.memory_space<vmem>>, %arg6: memref<1x32x256xf32, #tpu.memory_space<vmem>>, %arg7: memref<1x32x256xf32, #tpu.memory_space<vmem>>) attributes {dimension_semantics = [#tpu.dimension_semantics<parallel>, #tpu.dimension_semantics<parallel>], iteration_bounds = array<i64: 2, 1>, scalar_prefetch = 0 : i64, scratch_operands = 0 : i64, tpu.core_type = #tpu.core_type<tc>, window_params = [{transform_indices = @transform_0, window_bounds = array<i64: 1, 324, 256>}, {pipeline_mode = #tpu.pipeline_mode<synchronous>, transform_indices = @transform_1, window_bounds = array<i64: 128, 324>}, {pipeline_mode = #tpu.pipeline_mode<synchronous>, transform_indices = @transform_2, window_bounds = array<i64: 128, 1>}, {transform_indices = @transform_3, window_bounds = array<i64: 1, 32, 256>}, {transform_indices = @transform_4, window_bounds = array<i64: 1, 32, 256>}, {transform_indices = @transform_5, window_bounds = array<i64: 1, 32, 256>}]} {
    %c0 = arith.constant 0 : index
    %c0_0 = arith.constant 0 : index
    %0 = vector.load %arg3[%c0, %c0_0] : memref<128x324xbf16, #tpu.memory_space<vmem>>, vector<128x324xbf16>
    %c0_1 = arith.constant 0 : index
    %c0_2 = arith.constant 0 : index
    %c0_3 = arith.constant 0 : index
    %1 = vector.load %arg2[%c0_1, %c0_2, %c0_3] : memref<1x324x256xbf16, #tpu.memory_space<vmem>>, vector<1x324x256xbf16>
    %2 = vector.shape_cast %1 : vector<1x324x256xbf16> to vector<324x256xbf16>
    %cst = arith.constant dense<0.000000e+00> : vector<128x256xf32>
    %3 = tpu.matmul %0, %2, %cst {dimension_numbers = #tpu.dot_dimension_numbers<[1], [0], [0], [1], [0, 0, 1, 1], [], []>} : vector<128x324xbf16>, vector<324x256xbf16>, vector<128x256xf32> -> vector<128x256xf32>
    %c0_4 = arith.constant 0 : index
    %c0_5 = arith.constant 0 : index
    %4 = vector.load %arg4[%c0_4, %c0_5] : memref<128x1xf32, #tpu.memory_space<vmem>>, vector<128x1xf32>
    %5 = vector.broadcast %4 : vector<128x1xf32> to vector<128x256xf32>
    %6 = arith.addf %3, %5 : vector<128x256xf32>
    %7 = vector.extract_strided_slice %6 {offsets = [0, 0], sizes = [32, 256], strides = [1, 1]} : vector<128x256xf32> to vector<32x256xf32>
    %8 = arith.negf %7 : vector<32x256xf32>
    %9 = math.exp %8 : vector<32x256xf32>
    %cst_6 = arith.constant 1.000000e+00 : f32
    %10 = vector.broadcast %cst_6 : f32 to vector<32x256xf32>
    %11 = arith.addf %10, %9 : vector<32x256xf32>
    %12 = arith.divf %10, %11 : vector<32x256xf32>
    %13 = vector.extract_strided_slice %6 {offsets = [32, 0], sizes = [32, 256], strides = [1, 1]} : vector<128x256xf32> to vector<32x256xf32>
    %14 = arith.negf %13 : vector<32x256xf32>
    %15 = math.exp %14 : vector<32x256xf32>
    %cst_7 = arith.constant 1.000000e+00 : f32
    %16 = vector.broadcast %cst_7 : f32 to vector<32x256xf32>
    %17 = arith.addf %16, %15 : vector<32x256xf32>
    %18 = arith.divf %16, %17 : vector<32x256xf32>
    %19 = vector.extract_strided_slice %6 {offsets = [64, 0], sizes = [32, 256], strides = [1, 1]} : vector<128x256xf32> to vector<32x256xf32>
    %20 = arith.negf %19 : vector<32x256xf32>
    %21 = math.exp %20 : vector<32x256xf32>
    %cst_8 = arith.constant 1.000000e+00 : f32
    %22 = vector.broadcast %cst_8 : f32 to vector<32x256xf32>
    %23 = arith.addf %22, %21 : vector<32x256xf32>
    %24 = arith.divf %22, %23 : vector<32x256xf32>
    %25 = vector.extract_strided_slice %6 {offsets = [96, 0], sizes = [32, 256], strides = [1, 1]} : vector<128x256xf32> to vector<32x256xf32>
    %26 = math.tanh %25 : vector<32x256xf32>
    %c0_9 = arith.constant 0 : index
    %c0_10 = arith.constant 0 : index
    %c0_11 = arith.constant 0 : index
    %27 = vector.load %arg5[%c0_9, %c0_10, %c0_11] : memref<1x32x256xf32, #tpu.memory_space<vmem>>, vector<1x32x256xf32>
    %28 = vector.shape_cast %27 : vector<1x32x256xf32> to vector<32x256xf32>
    %29 = arith.mulf %18, %28 : vector<32x256xf32>
    %30 = arith.mulf %12, %26 : vector<32x256xf32>
    %31 = arith.addf %29, %30 : vector<32x256xf32>
    %32 = math.tanh %31 : vector<32x256xf32>
    %33 = arith.mulf %24, %32 : vector<32x256xf32>
    %c0_12 = arith.constant 0 : index
    %c0_13 = arith.constant 0 : index
    %c0_14 = arith.constant 0 : index
    %34 = vector.load %arg6[%c0_12, %c0_13, %c0_14] : memref<1x32x256xf32, #tpu.memory_space<vmem>>, vector<1x32x256xf32>
    %35 = vector.shape_cast %34 : vector<1x32x256xf32> to vector<32x256xf32>
    %36 = vector.shape_cast %33 : vector<32x256xf32> to vector<1x32x256xf32>
    tpu.vector_store %arg6[%c0_12, %c0_13, %c0_14], %36 {strides = array<i32>} : memref<1x32x256xf32, #tpu.memory_space<vmem>>, vector<1x32x256xf32>,
    %c0_15 = arith.constant 0 : index
    %c0_16 = arith.constant 0 : index
    %c0_17 = arith.constant 0 : index
    %37 = vector.load %arg7[%c0_15, %c0_16, %c0_17] : memref<1x32x256xf32, #tpu.memory_space<vmem>>, vector<1x32x256xf32>
    %38 = vector.shape_cast %37 : vector<1x32x256xf32> to vector<32x256xf32>
    %39 = vector.shape_cast %31 : vector<32x256xf32> to vector<1x32x256xf32>
    tpu.vector_store %arg7[%c0_15, %c0_16, %c0_17], %39 {strides = array<i32>} : memref<1x32x256xf32, #tpu.memory_space<vmem>>, vector<1x32x256xf32>,
    return
  }
  func.func @transform_0(%arg0: i32, %arg1: i32) -> (i32, i32, i32) {
    %c0_i32 = arith.constant 0 : i32
    %c0_i32_0 = arith.constant 0 : i32
    return %arg0, %c0_i32, %arg1 : i32, i32, i32
  }
  func.func @transform_1(%arg0: i32, %arg1: i32) -> (i32, i32) {
    %c0_i32 = arith.constant 0 : i32
    %c0_i32_0 = arith.constant 0 : i32
    %c0_i32_1 = arith.constant 0 : i32
    return %c0_i32, %c0_i32_0 : i32, i32
  }
  func.func @transform_2(%arg0: i32, %arg1: i32) -> (i32, i32) {
    %c0_i32 = arith.constant 0 : i32
    %c0_i32_0 = arith.constant 0 : i32
    %c0_i32_1 = arith.constant 0 : i32
    return %c0_i32, %c0_i32_0 : i32, i32
  }
  func.func @transform_3(%arg0: i32, %arg1: i32) -> (i32, i32, i32) {
    %c0_i32 = arith.constant 0 : i32
    %c0_i32_0 = arith.constant 0 : i32
    return %arg0, %c0_i32, %arg1 : i32, i32, i32
  }
  func.func @transform_4(%arg0: i32, %arg1: i32) -> (i32, i32, i32) {
    %c0_i32 = arith.constant 0 : i32
    %c0_i32_0 = arith.constant 0 : i32
    return %arg0, %c0_i32, %arg1 : i32, i32, i32
  }
  func.func @transform_5(%arg0: i32, %arg1: i32) -> (i32, i32, i32) {
    %c0_i32 = arith.constant 0 : i32
    %c0_i32_0 = arith.constant 0 : i32
    return %arg0, %c0_i32, %arg1 : i32, i32, i32
  }
}

</mosaic_0001>

<bundles_post_ra>
// kernel: conv_lstm_cell.1
= control target key start
LH: loop header
LB: loop body
LE: loop exit
PB: predicated region body
PF: predicated region fallthrough
CT: control target
= control target key end

     0   :  { %s1933_s18 = smov 0   ;;  %s1935_s19 = smov 0   ;;  %s2303_s0 = inlined_call_operand.vmem [shape: bf16[2,324,256], index: 0, kind: input, shape index: {}]   ;;  %s2304_s1 = inlined_call_operand.vmem [shape: bf16[128,324], index: 1, kind: input, shape index: {}]   ;;  %s2305_s2 = inlined_call_operand.vmem [shape: f32[128,1], index: 2, kind: input, shape index: {}]   ;;  %s2306_s3 = inlined_call_operand.vmem [shape: f32[2,32,256], index: 3, kind: input, shape index: {}]   ;;  %s2307_s4 = inlined_call_operand.vmem [shape: f32[2,32,256], index: 4, kind: output, shape index: {0}]   ;;  %s2308_s5 = inlined_call_operand.vmem [shape: f32[2,32,256], index: 5, kind: output, shape index: {1}]  }
   0x1   :  { %s1937_s20 = smov 0  }
   0x2 LB: > { %s28_s21 = sadd.s32 1, %s1896_s19  ;;  %p1452_p0 = scmp.ge.s32.totalorder %s1900_s20, 1  ;;  %s1900_s20 = sphi %s1937_s20, %s16_s20   ;;  %s1896_s19 = sphi %s1935_s19, %s2310_s19   ;;  %s1892_s18 = sphi %s1933_s18, %s2309_s18  }
   0x3   : > { %p30_p1 = scmp.ge.s32.totalorder %s28_s21, 2  ;;  %p230_p2 = scmp.lt.s32.totalorder %s1900_s20, 3 }
   0x5   : > { %s2312_s21 = smov (%p30_p1, %s28_s21), 0  ;;  %p231_p3 = pnand %p1452_p0, %p230_p2 }
   0x6   : > { %p285_p4 = scmp.lt.s32.totalorder (!%p231_p3), %s1892_s18, 1  ;;  %v1902_v0 = vmov (!%p231_p3), 0   ;;  %v1720_v1 = vld [vmem:[%s2304_s1 + $0x4] ss:$12 sps:$4 sm:$0xff] (!%p231_p3)   ;;  %vm844_vm0 = vcmask (!%p231_p3), 1041408   ;;  %vm819_vm1 = vcmask (!%p231_p3), 556032  }
   0x7   : > { %234 = sbr.rel (%p231_p3) target bundleno = 392 (0x188), region = 36  ;;  %996 = vmatprep.mubr.bf16.mxu0 (!%p231_p3), %v1902_v0  ;;  %1654 = vset.pattern.permute.xlu0 (!%p231_p3), %v1902_v0  ;;  %v1721_v33 = vld [vmem:[%s2304_s1 + $0x8] ss:$12 sps:$4 sm:$0xff] (!%p231_p3)   ;;  %v398_v37 = vld [vmem:[%s2305_s2] sm:$0xff] (!%p231_p3)  ;;  %v401_v42 = vld [vmem:[%s2305_s2 + $0x18] sm:$0xff] (!%p231_p3) }
   0x8   : > { %1655 = vset.pattern.permute.xlu1 (!%p231_p3), %v1902_v0  ;;  %883 = vmatprep.mubr.bf16.mxu1 (!%p231_p3), %v1720_v1  ;;  %v400_v38 = vld [vmem:[%s2305_s2 + $0x10] sm:$0xff] (!%p231_p3)  ;;  %v1724_v40 = vld [vmem:[%s2304_s1 + $0x20] ss:$12 sps:$4 sm:$0xff] (!%p231_p3)   ;;  %v1728_v49 = vld [vmem:[%s2304_s1 + $0x38] ss:$12 sps:$4 sm:$0xff] (!%p231_p3)  }
   0x9   : > { %416 = vperm.xlu0 (!%p231_p3), %1654, %v398_v37   ;;  %v399_v41 = vld [vmem:[%s2305_s2 + $0x8] sm:$0xff] (!%p231_p3)  ;;  %426 = vperm.xlu1 (!%p231_p3), %1655, %v400_v38   ;;  %v402_v45 = vld [vmem:[%s2305_s2 + $0x20] sm:$0xff] (!%p231_p3)  ;;  %v404_v50 = vld [vmem:[%s2305_s2 + $0x30] sm:$0xff] (!%p231_p3) }
   0xa   : > { %v403_v46 = vld [vmem:[%s2305_s2 + $0x28] sm:$0xff] (!%p231_p3)  ;;  %v405_v51 = vld [vmem:[%s2305_s2 + $0x38] sm:$0xff] (!%p231_p3)  ;;  %v406_v54 = vld [vmem:[%s2305_s2 + $0x40] sm:$0xff] (!%p231_p3) }
   0xb   : > { %v407_v55 = vld [vmem:[%s2305_s2 + $0x48] sm:$0xff] (!%p231_p3)  ;;  %v1732_v58 = vld [vmem:[%s2304_s1 + $0x50] ss:$12 sps:$4 sm:$0xff] (!%p231_p3)   ;;  %v410_v62 = vld [vmem:[%s2305_s2 + $0x60] sm:$0xff] (!%p231_p3) }
   0xc   : > { %v408_v59 = vld [vmem:[%s2305_s2 + $0x50] sm:$0xff] (!%p231_p3)  ;;  %v409_v60 = vld [vmem:[%s2305_s2 + $0x58] sm:$0xff] (!%p231_p3)  ;;  %v1718_v63 = vld [vmem:[%s2304_s1] ss:$12 sps:$4 sm:$0xff] (!%p231_p3)  }
   0xd   : > { %421 = vperm.xlu0 (!%p231_p3), %1654, %v399_v41   ;;  %431 = vperm.xlu1 (!%p231_p3), %1655, %v401_v42   ;;  %v411_v1 = vld [vmem:[%s2305_s2 + $0x68] sm:$0xff] (!%p231_p3) }
   0xe   : > { %s2314_s18 = smov (!%p285_p4, %s1892_s18), 1 }
   0xf   : > { %s1628_s24 = smul.u32 328, %s2314_s18  ;;  %s2224_s23 = sshll.u32 %s2314_s18, 6 }
  0x10   : > { %s2232_s25 = scalar_lea.vmem %s2306_s3, %s2224_s23  ;;  %s2248_s28 = scalar_lea.vmem %s2308_s5, %s2224_s23 }
  0x11   : > { %s1963_s27 = scalar_lea.vmem %s2303_s0, %s1628_s24  ;;  %436 = vperm.xlu0 %1654, %v402_v45   ;;  %441 = vperm.xlu1 %1655, %v403_v46   ;;  %s2278_s6 = scalar_lea.vmem %s2307_s4, %s2224_s23 }
  0x12   : > { %v1656_v2 = vld [vmem:[%s1963_s27 + $0x4] ss:$8 sps:$4 sm:$0xff]   ;;  %v1658_v3 = vld [vmem:[%s1963_s27] ss:$8 sps:$4 sm:$0xff]   ;;  %v1659_v4 = vld [vmem:[%s1963_s27 + $0x14] ss:$8 sps:$4 sm:$0xff]  }
  0x13   : > { %851 = vmatprep.subr.bf16.mxu1 %v1656_v2  ;;  %v1661_v5 = vld [vmem:[%s1963_s27 + $0x10] ss:$8 sps:$4 sm:$0xff]   ;;  %v1662_v6 = vld [vmem:[%s1963_s27 + $0x24] ss:$8 sps:$4 sm:$0xff]   ;;  %v1664_v7 = vld [vmem:[%s1963_s27 + $0x20] ss:$8 sps:$4 sm:$0xff]  }
  0x14   : > { %852 = vmatpush1.bf16.msra.mxu1 %v1658_v3  ;;  %v1665_v8 = vld [vmem:[%s1963_s27 + $0x34] ss:$8 sps:$4 sm:$0xff]   ;;  %v1667_v9 = vld [vmem:[%s1963_s27 + $0x30] ss:$8 sps:$4 sm:$0xff]   ;;  %v1668_v10 = vld [vmem:[%s1963_s27 + $0x44] ss:$8 sps:$4 sm:$0xff]  }
  0x15   : > { %853 = vmatprep.subr.bf16.mxu1 %v1659_v4  ;;  %v1670_v11 = vld [vmem:[%s1963_s27 + $0x40] ss:$8 sps:$4 sm:$0xff]   ;;  %v1689_v12 = vld [vmem:[%s1963_s27 + $0x104] ss:$8 sps:$4 sm:$0xff]   ;;  %v1671_v13 = vld [vmem:[%s1963_s27 + $0x54] ss:$8 sps:$4 sm:$0xff]   ;;  %446 = vperm.xlu0 %1654, %v404_v50  }
  0x16   : > { %v1693_v14 = vld [vmem:[%s1963_s27 + $0x100] ss:$8 sps:$4 sm:$0xff]   ;;  %964 = vmatprep.subr.bf16.mxu0 %v1689_v12  ;;  %v1695_v15 = vld [vmem:[%s1963_s27 + $0x114] ss:$8 sps:$4 sm:$0xff]   ;;  %v1673_v16 = vld [vmem:[%s1963_s27 + $0x50] ss:$8 sps:$4 sm:$0xff]   ;;  %451 = vperm.xlu1 %1655, %v405_v51  }
  0x17   : > { %965 = vmatpush1.bf16.msra.mxu0 %v1693_v14  ;;  %v1674_v17 = vld [vmem:[%s1963_s27 + $0x64] ss:$8 sps:$4 sm:$0xff]   ;;  %v1699_v18 = vld [vmem:[%s1963_s27 + $0x110] ss:$8 sps:$4 sm:$0xff]   ;;  %v1676_v20 = vld [vmem:[%s1963_s27 + $0x60] ss:$8 sps:$4 sm:$0xff]  }
  0x18   : > { %854 = vmatpush1.bf16.msra.mxu1 %v1661_v5  ;;  %966 = vmatprep.subr.bf16.mxu0 %v1695_v15  ;;  %v1701_v19 = vld [vmem:[%s1963_s27 + $0x124] ss:$8 sps:$4 sm:$0xff]   ;;  %v1705_v21 = vld [vmem:[%s1963_s27 + $0x120] ss:$8 sps:$4 sm:$0xff]   ;;  %v1707_v22 = vld [vmem:[%s1963_s27 + $0x134] ss:$8 sps:$4 sm:$0xff]  }
  0x19   : > { %855 = vmatprep.subr.bf16.mxu1 %v1662_v6  ;;  %v1677_v23 = vld [vmem:[%s1963_s27 + $0x74] ss:$8 sps:$4 sm:$0xff]   ;;  %v397_v24 = vld [vmem:[%s1963_s27 + $0x140] sm:$0x33]  ;;  %v1711_v25 = vld [vmem:[%s1963_s27 + $0x130] ss:$8 sps:$4 sm:$0xff]   ;;  %456 = vperm.xlu0 %1654, %v406_v54  }
  0x1a   : > { %v1679_v26 = vld [vmem:[%s1963_s27 + $0x70] ss:$8 sps:$4 sm:$0xff]   ;;  %v1525_v27 = vcombine.high %v397_v24, %v397_v24  ;;  %v1524_v28 = vcombine.low %v397_v24, %v397_v24  ;;  %v1680_v29 = vld [vmem:[%s1963_s27 + $0x84] ss:$8 sps:$4 sm:$0xff]   ;;  %v1682_v30 = vld [vmem:[%s1963_s27 + $0x80] ss:$8 sps:$4 sm:$0xff]   ;;  %461 = vperm.xlu1 %1655, %v407_v55  }
  0x1b   : > { %967 = vmatpush1.bf16.msra.mxu0 %v1699_v18  ;;  %v1683_v32 = vld [vmem:[%s1963_s27 + $0x94] ss:$8 sps:$4 sm:$0xff]   ;;  %v1685_v34 = vld [vmem:[%s1963_s27 + $0x90] ss:$8 sps:$4 sm:$0xff]   ;;  %v1686_v35 = vld [vmem:[%s1963_s27 + $0xa4] ss:$8 sps:$4 sm:$0xff]  }
  0x1c   : > { %856 = vmatpush1.bf16.msra.mxu1 %v1664_v7  ;;  %968 = vmatprep.subr.bf16.mxu0 %v1701_v19  ;;  %v846_v31 = vsel %vm844_vm0, %v1524_v28, 0  ;;  %v1688_v36 = vld [vmem:[%s1963_s27 + $0xa0] ss:$8 sps:$4 sm:$0xff]   ;;  %v1691_v39 = vld [vmem:[%s1963_s27 + $0xb4] ss:$8 sps:$4 sm:$0xff]  }
  0x1d   : > { %857 = vmatprep.subr.bf16.mxu1 %v1665_v8  ;;  %v1694_v43 = vld [vmem:[%s1963_s27 + $0xb0] ss:$8 sps:$4 sm:$0xff]   ;;  %v1697_v44 = vld [vmem:[%s1963_s27 + $0xc4] ss:$8 sps:$4 sm:$0xff]   ;;  %v1700_v47 = vld [vmem:[%s1963_s27 + $0xc0] ss:$8 sps:$4 sm:$0xff]   ;;  %466 = vperm.xlu0 %1654, %v408_v59  }
  0x1e   : > { %v1703_v48 = vld [vmem:[%s1963_s27 + $0xd4] ss:$8 sps:$4 sm:$0xff]   ;;  %v1706_v52 = vld [vmem:[%s1963_s27 + $0xd0] ss:$8 sps:$4 sm:$0xff]   ;;  %v1709_v53 = vld [vmem:[%s1963_s27 + $0xe4] ss:$8 sps:$4 sm:$0xff]   ;;  %471 = vperm.xlu1 %1655, %v409_v60  }
  0x1f   : > { %969 = vmatpush1.bf16.msra.mxu0 %v1705_v21  ;;  %v1712_v56 = vld [vmem:[%s1963_s27 + $0xe0] ss:$8 sps:$4 sm:$0xff]   ;;  %v1714_v57 = vld [vmem:[%s1963_s27 + $0xf4] ss:$8 sps:$4 sm:$0xff]   ;;  %v1717_v61 = vld [vmem:[%s1963_s27 + $0xf0] ss:$8 sps:$4 sm:$0xff]  }
  0x20   : > { %858 = vmatpush1.bf16.msra.mxu1 %v1667_v9  ;;  %970 = vmatprep.subr.bf16.mxu0 %v1707_v22  ;;  %v1722_v2 = vld [vmem:[%s2304_s1 + $0x1c] ss:$12 sps:$4 sm:$0xff]   ;;  %v412_v4 = vld [vmem:[%s2305_s2 + $0x70] sm:$0xff]  ;;  %v1725_v6 = vld [vmem:[%s2304_s1 + $0x18] ss:$12 sps:$4 sm:$0xff]  }
  0x21   : > { %859 = vmatprep.subr.bf16.mxu1 %v1668_v10  ;;  %476 = vperm.xlu0 %1654, %v410_v62   ;;  %v1736_v3 = vld [vmem:[%s2304_s1 + $0x68] ss:$12 sps:$4 sm:$0xff]   ;;  %v413_v5 = vld [vmem:[%s2305_s2 + $0x78] sm:$0xff]  ;;  %v1740_v8 = vld [vmem:[%s2304_s1 + $0x80] ss:$12 sps:$4 sm:$0xff]  }
  0x22   : > { %481 = vperm.xlu1 %1655, %v411_v1   ;;  %v1726_v7 = vld [vmem:[%s2304_s1 + $0x34] ss:$12 sps:$4 sm:$0xff]   ;;  %v1729_v9 = vld [vmem:[%s2304_s1 + $0x30] ss:$12 sps:$4 sm:$0xff]   ;;  %v1730_v10 = vld [vmem:[%s2304_s1 + $0x4c] ss:$12 sps:$4 sm:$0xff]  }
  0x23   : > { %971 = vmatpush1.bf16.msra.mxu0 %v1711_v25  ;;  %v1733_v12 = vld [vmem:[%s2304_s1 + $0x48] ss:$12 sps:$4 sm:$0xff]   ;;  %v1748_v14 = vld [vmem:[%s2304_s1 + $0xb0] ss:$12 sps:$4 sm:$0xff]   ;;  %v1737_v15 = vld [vmem:[%s2304_s1 + $0x60] ss:$12 sps:$4 sm:$0xff]  }
  0x24   : > { %860 = vmatpush1.bf16.msra.mxu1 %v1670_v11  ;;  %1526 = vmatprep.subr.msk.bf16.mxu0 %vm844_vm0, %v1525_v27  ;;  %v1744_v11 = vld [vmem:[%s2304_s1 + $0x98] ss:$12 sps:$4 sm:$0xff]   ;;  %v1745_v18 = vld [vmem:[%s2304_s1 + $0x90] ss:$12 sps:$4 sm:$0xff]  }
  0x25   : > { %861 = vmatprep.subr.bf16.mxu1 %v1671_v13  ;;  %486 = vperm.xlu0 %1654, %v412_v4   ;;  %v1734_v13 = vld [vmem:[%s2304_s1 + $0x64] ss:$12 sps:$4 sm:$0xff]   ;;  %v1746_v19 = vld [vmem:[%s2304_s1 + $0xac] ss:$12 sps:$4 sm:$0xff]  }
  0x26   : > { %491 = vperm.xlu1 %1655, %v413_v5  }
  0x27   : > { %973 = vmatpush1.bf16.msra.mxu0 %v846_v31 }
  0x28   : > { %862 = vmatpush1.bf16.msra.mxu1 %v1673_v16  ;;  %v1741_v16 = vld [vmem:[%s2304_s1 + $0x78] ss:$12 sps:$4 sm:$0xff]  }
  0x29   : > { %863 = vmatprep.subr.bf16.mxu1 %v1674_v17  ;;  %v1742_v17 = vld [vmem:[%s2304_s1 + $0x94] ss:$12 sps:$4 sm:$0xff]  }
  0x2a   : > { %1527 = vmatmul.mubr.msk.bf16.vlgmr.msra.gmra.mrb[0].mxu0 %vm819_vm1, %v1721_v33 }
  0x2b   : > { %1006 = vmatprep.mubr.bf16.mxu0 %v1902_v0 }
  0x2c   : > { %864 = vmatpush1.bf16.msra.mxu1 %v1676_v20  ;;  %v1749_v20 = vld [vmem:[%s2304_s1 + $0xa8] ss:$12 sps:$4 sm:$0xff]  }
  0x2d   : > { %865 = vmatprep.subr.bf16.mxu1 %v1677_v23 }
  0x30   : > { %866 = vmatpush1.bf16.msra.mxu1 %v1679_v26 }
  0x31   : > { %867 = vmatprep.subr.bf16.mxu1 %v1680_v29 }
  0x32   : > { %1528 = vmatmul.mubr.msk.bf16.gmra.mrb[4].mxu0 %vm819_vm1, %v1724_v40 }
  0x33   : > { %1016 = vmatprep.mubr.bf16.mxu0 %v1902_v0 }
  0x34   : > { %868 = vmatpush1.bf16.msra.mxu1 %v1682_v30 }
  0x35   : > { %869 = vmatprep.subr.bf16.mxu1 %v1683_v32 }
  0x38   : > { %870 = vmatpush1.bf16.msra.mxu1 %v1685_v34 }
  0x39   : > { %871 = vmatprep.subr.bf16.mxu1 %v1686_v35 }
  0x3a   : > { %1529 = vmatmul.mubr.msk.bf16.gmra.mrb[8].mxu0 %vm819_vm1, %v1728_v49 }
  0x3b   : > { %1026 = vmatprep.mubr.bf16.mxu0 %v1902_v0 }
  0x3c   : > { %872 = vmatpush1.bf16.msra.mxu1 %v1688_v36 }
  0x3d   : > { %873 = vmatprep.subr.bf16.mxu1 %v1691_v39 }
  0x40   : > { %874 = vmatpush1.bf16.msra.mxu1 %v1694_v43 }
  0x41   : > { %875 = vmatprep.subr.bf16.mxu1 %v1697_v44 }
  0x42   : > { %1530 = vmatmul.mubr.msk.bf16.gmra.mrb[12].mxu0 %vm819_vm1, %v1732_v58 }
  0x43   : > { %1036 = vmatprep.mubr.bf16.mxu0 %v1902_v0 }
  0x44   : > { %876 = vmatpush1.bf16.msra.mxu1 %v1700_v47 }
  0x45   : > { %877 = vmatprep.subr.bf16.mxu1 %v1703_v48 }
  0x48   : > { %878 = vmatpush1.bf16.msra.mxu1 %v1706_v52 }
  0x49   : > { %879 = vmatprep.subr.bf16.mxu1 %v1709_v53 }
  0x4a   : > { %1531 = vmatmul.mubr.msk.bf16.gmra.mrb[16].mxu0 %vm819_vm1, %v1736_v3 }
  0x4b   : > { %1046 = vmatprep.mubr.bf16.mxu0 %v1902_v0 }
  0x4c   : > { %880 = vmatpush1.bf16.msra.mxu1 %v1712_v56 }
  0x4d   : > { %881 = vmatprep.subr.bf16.mxu1 %v1714_v57 }
  0x50   : > { %882 = vmatpush1.bf16.msra.mxu1 %v1717_v61 }
  0x52   : > { %1532 = vmatmul.mubr.msk.bf16.gmra.mrb[20].mxu0 %vm819_vm1, %v1740_v8 }
  0x53   : > { %884 = vmatmul.mubr.bf16.vlgmr.msra.gmra.mrb[0].mxu1 %v1718_v63  ;;  %1056 = vmatprep.mubr.bf16.mxu0 %v1902_v0 }
  0x54   : > { %893 = vmatprep.mubr.bf16.mxu1 %v1722_v2 }
  0x5a   : > { %1533 = vmatmul.mubr.msk.bf16.gmra.mrb[24].mxu0 %vm819_vm1, %v1744_v11 }
  0x5b   : > { %894 = vmatmul.mubr.bf16.gmra.mrb[4].mxu1 %v1725_v6  ;;  %1066 = vmatprep.mubr.bf16.mxu0 %v1902_v0  ;;  %v1738_v0 = vld [vmem:[%s2304_s1 + $0x7c] ss:$12 sps:$4 sm:$0xff]  }
  0x5c   : > { %903 = vmatprep.mubr.bf16.mxu1 %v1726_v7 }
  0x62   : > { %1534 = vmatmul.mubr.msk.bf16.gmra.mrb[28].mxu0 %vm819_vm1, %v1748_v14 }
  0x63   : > { %904 = vmatmul.mubr.bf16.gmra.mrb[8].mxu1 %v1729_v9 }
  0x64   : > { %913 = vmatprep.mubr.bf16.mxu1 %v1730_v10 }
  0x6b   : > { %914 = vmatmul.mubr.bf16.gmra.mrb[12].mxu1 %v1733_v12 }
  0x6c   : > { %923 = vmatprep.mubr.bf16.mxu1 %v1734_v13 }
  0x73   : > { %924 = vmatmul.mubr.bf16.gmra.mrb[16].mxu1 %v1737_v15 }
  0x74   : > { %933 = vmatprep.mubr.bf16.mxu1 %v1738_v0 }
  0x7b   : > { %934 = vmatmul.mubr.bf16.gmra.mrb[20].mxu1 %v1741_v16 }
  0x7c   : > { %943 = vmatprep.mubr.bf16.mxu1 %v1742_v17 }
  0x83   : > { %944 = vmatmul.mubr.bf16.gmra.mrb[24].mxu1 %v1745_v18 }
  0x84   : > { %953 = vmatprep.mubr.bf16.mxu1 %v1746_v19 }
  0x88   : > { %v417_v33 = vpop.permute.xlu0 %416  ;;  %v427_v49 = vpop.permute.xlu1 %426 }
  0x8b   : > { %954 = vmatmul.mubr.bf16.gmra.mrb[28].mxu1 %v1749_v20 }
  0x8c   : > { %v422_v39 = vpop.permute.xlu0 %421  ;;  %v432_v60 = vpop.permute.xlu1 %431 }
  0x90   : > { %v437_v14 = vpop.permute.xlu0 %436  ;;  %v442_v18 = vpop.permute.xlu1 %441 }
  0xfd   : > { %v998_v21 = vpop.f32.mrb[0].mxu0 }
  0xfe   : > { %v1000_v22 = vpop.f32.mrb[1].mxu0 }
  0xff   : > { %v1002_v23 = vpop.f32.mrb[2].mxu0 }
 0x100   : > { %v1004_v24 = vpop.f32.mrb[3].mxu0 }
 0x105   : > { %v1008_v25 = vpop.f32.mrb[4].mxu0 }
 0x106   : > { %v1010_v26 = vpop.f32.mrb[5].mxu0 }
 0x107   : > { %v1012_v27 = vpop.f32.mrb[6].mxu0 }
 0x108   : > { %v1014_v28 = vpop.f32.mrb[7].mxu0 }
 0x10d   : > { %v1018_v29 = vpop.f32.mrb[8].mxu0 }
 0x10e   : > { %v2138_v30 = vpop.f32.mrb[9].mxu0 }
 0x10f   : > { %v2140_v31 = vpop.f32.mrb[10].mxu0 }
 0x110   : > { %v2142_v32 = vpop.f32.mrb[11].mxu0 }
 0x115   : > { %v2144_v34 = vpop.f32.mrb[12].mxu0 }
 0x116   : > { %v2146_v35 = vpop.f32.mrb[13].mxu0 }
 0x117   : > { %v2148_v36 = vpop.f32.mrb[14].mxu0 }
 0x118   : > { %v2150_v37 = vpop.f32.mrb[15].mxu0 }
 0x11d   : > { %v2152_v47 = vpop.f32.mrb[16].mxu0 }
 0x11e   : > { %v2154_v51 = vpop.f32.mrb[17].mxu0 }
 0x11f   : > { %v2156_v53 = vpop.f32.mrb[18].mxu0 }
 0x120   : > { %v2158_v55 = vpop.f32.mrb[19].mxu0 }
 0x125   : > { %v2160_v4 = vpop.f32.mrb[20].mxu0 }
 0x126   : > { %v885_v38 = vpop.f32.mrb[0].mxu1  ;;  %v2162_v8 = vpop.f32.mrb[21].mxu0 }
 0x127   : > { %v886_v40 = vadd.f32 %v885_v38, %v417_v33  ;;  %v887_v41 = vpop.f32.mrb[1].mxu1  ;;  %v2164_v10 = vpop.f32.mrb[22].mxu0 }
 0x128   : > { %v888_v42 = vadd.f32 %v887_v41, %v417_v33  ;;  %v889_v43 = vpop.f32.mrb[2].mxu1  ;;  %v2166_v12 = vpop.f32.mrb[23].mxu0 }
 0x129   : > { %v999_v44 = vadd.f32 %v998_v21, %v886_v40  ;;  %v890_v45 = vadd.f32 %v889_v43, %v422_v39  ;;  %v891_v46 = vpop.f32.mrb[3].mxu1 }
 0x12a   : > { %v1001_v48 = vadd.f32 %v1000_v22, %v888_v42  ;;  %v892_v50 = vadd.f32 %v891_v46, %v422_v39 }
 0x12b   : > { %v1003_v52 = vadd.f32 %v1002_v23, %v890_v45  ;;  %v1535_v59 = vmul.f32 -1.442695, %v999_v44  ;;  %v447_v45 = vpop.permute.xlu0 %446 }
 0x12c   : > { %v1005_v54 = vadd.f32 %v1004_v24, %v892_v50  ;;  %v1536_v63 = vmul.f32 -1.442695, %v1001_v48 }
 0x12d   : > { %v1537_v5 = vmul.f32 -1.442695, %v1003_v52  ;;  %1750 = vpow2.f32 %v1535_v59 }
 0x12e   : > { %v895_v56 = vpop.f32.mrb[4].mxu1  ;;  %1752 = vpow2.f32 %v1536_v63  ;;  %v1538_v13 = vmul.f32 -1.442695, %v1005_v54  ;;  %v452_v54 = vpop.permute.xlu1 %451 }
 0x12f   : > { %v896_v57 = vadd.f32 %v895_v56, %v427_v49  ;;  %v897_v58 = vpop.f32.mrb[5].mxu1  ;;  %1754 = vpow2.f32 %v1537_v5 }
 0x130   : > { %v898_v61 = vadd.f32 %v897_v58, %v427_v49  ;;  %v899_v62 = vpop.f32.mrb[6].mxu1  ;;  %1756 = vpow2.f32 %v1538_v13 }
 0x131   : > { %v1009_v1 = vadd.f32 %v1008_v25, %v896_v57  ;;  %v900_v2 = vadd.f32 %v899_v62, %v432_v60  ;;  %v901_v3 = vpop.f32.mrb[7].mxu1  ;;  %v2168_v25 = vpop.f32.mrb[24].mxu0 }
 0x132   : > { %v1011_v6 = vadd.f32 %v1010_v26, %v898_v61  ;;  %v902_v7 = vadd.f32 %v901_v3, %v432_v60  ;;  %v2171_v33 = vpop.f32.mrb[25].mxu0 }
 0x133   : > { %v1013_v9 = vadd.f32 %v1012_v27, %v900_v2  ;;  %v1539_v0 = vmul.f32 -1.442695, %v1009_v1  ;;  %v2174_v40 = vpop.f32.mrb[26].mxu0 }
 0x134   : > { %v1015_v11 = vadd.f32 %v1014_v28, %v902_v7  ;;  %v1540_v21 = vmul.f32 -1.442695, %v1011_v6 }
 0x135   : > { %v1541_v26 = vmul.f32 -1.442695, %v1013_v9  ;;  %1758 = vpow2.f32 %v1539_v0 }
 0x136   : > { %v905_v15 = vpop.f32.mrb[8].mxu1  ;;  %v1542_v38 = vmul.f32 -1.442695, %v1015_v11  ;;  %1760 = vpow2.f32 %v1540_v21  ;;  %v462_v21 = vpop.permute.xlu1 %461 }
 0x137   : > { %v906_v16 = vadd.f32 %v905_v15, %v437_v14  ;;  %v907_v17 = vpop.f32.mrb[9].mxu1  ;;  %v1751_v44 = vpop.eup %1750  ;;  %1762 = vpow2.f32 %v1541_v26 }
 0x138   : > { %v908_v19 = vadd.f32 %v907_v17, %v437_v14  ;;  %v909_v20 = vpop.f32.mrb[10].mxu1  ;;  %v1753_v48 = vpop.eup %1752  ;;  %1764 = vpow2.f32 %v1542_v38 }
 0x139   : > { %v1019_v22 = vadd.f32 %v1018_v29, %v906_v16  ;;  %v910_v23 = vadd.f32 %v909_v20, %v442_v18  ;;  %v911_v24 = vpop.f32.mrb[11].mxu1  ;;  %v2177_v29 = vpop.f32.mrb[27].mxu0  ;;  %v1102_v62 = vadd.f32 1.0, %v1753_v48 }
 0x13a   : > { %v1021_v27 = vadd.f32 %v2138_v30, %v908_v19  ;;  %v912_v28 = vadd.f32 %v911_v24, %v442_v18  ;;  %v2180_v61 = vpop.f32.mrb[28].mxu0  ;;  %v457_v15 = vpop.permute.xlu0 %456 }
 0x13b   : > { %v1023_v39 = vadd.f32 %v2140_v31, %v910_v23  ;;  %v1543_v41 = vmul.f32 -1.442695, %v1019_v22  ;;  %v1755_v31 = vpop.eup %1754  ;;  %v2183_v2 = vpop.f32.mrb[29].mxu0 }
 0x13c   : > { %v1025_v42 = vadd.f32 %v2142_v32, %v912_v28  ;;  %v1544_v43 = vmul.f32 -1.442695, %v1021_v27  ;;  %v1101_v32 = vadd.f32 1.0, %v1751_v44  ;;  %v1757_v3 = vpop.eup %1756  ;;  %v1103_v5 = vadd.f32 1.0, %v1755_v31  ;;  %v2186_v7 = vpop.f32.mrb[30].mxu0 }
 0x13d   : > { %v1545_v30 = vmul.f32 -1.442695, %v1023_v39  ;;  %1766 = vpow2.f32 %v1543_v41  ;;  %v2189_v11 = vpop.f32.mrb[31].mxu0 }
 0x13e   : > { %v915_v46 = vpop.f32.mrb[12].mxu1  ;;  %v1546_v49 = vmul.f32 -1.442695, %v1025_v42  ;;  %1768 = vpow2.f32 %v1544_v43 }
 0x13f   : > { %v916_v50 = vadd.f32 %v915_v46, %v447_v45  ;;  %v917_v52 = vpop.f32.mrb[13].mxu1  ;;  %1770 = vpow2.f32 %v1545_v30  ;;  %v1759_v13 = vpop.eup %1758 }
 0x140   : > { %v918_v56 = vadd.f32 %v917_v52, %v447_v45  ;;  %v919_v57 = vpop.f32.mrb[14].mxu1  ;;  %1772 = vpow2.f32 %v1546_v49  ;;  %v1761_v16 = vpop.eup %1760  ;;  %v1105_v20 = vadd.f32 1.0, %v1759_v13 }
 0x141   : > { %v1029_v58 = vadd.f32 %v2144_v34, %v916_v50  ;;  %v920_v59 = vadd.f32 %v919_v57, %v452_v54  ;;  %v921_v60 = vpop.f32.mrb[15].mxu1  ;;  %1774 = vrcp.f32 %v1101_v32  ;;  %v1106_v39 = vadd.f32 1.0, %v1761_v16  ;;  %v467_v52 = vpop.permute.xlu0 %466 }
 0x142   : > { %v1031_v63 = vadd.f32 %v2146_v35, %v918_v56  ;;  %v922_v1 = vadd.f32 %v921_v60, %v452_v54  ;;  %1776 = vrcp.f32 %v1102_v62  ;;  %v1104_v35 = vadd.f32 1.0, %v1757_v3 }
 0x143   : > { %v1033_v6 = vadd.f32 %v2148_v36, %v920_v59  ;;  %v1547_v9 = vmul.f32 -1.442695, %v1029_v58  ;;  %1778 = vrcp.f32 %v1103_v5  ;;  %v1763_v36 = vpop.eup %1762  ;;  %v472_v58 = vpop.permute.xlu1 %471 }
 0x144   : > { %v1035_v34 = vadd.f32 %v2150_v37, %v922_v1  ;;  %v1548_v14 = vmul.f32 -1.442695, %v1031_v63  ;;  %v1765_v23 = vpop.eup %1764  ;;  %v1107_v44 = vadd.f32 1.0, %v1763_v36 }
 0x145   : > { %v1549_v17 = vmul.f32 -1.442695, %v1033_v6  ;;  %1780 = vpow2.f32 %v1547_v9  ;;  %v1108_v46 = vadd.f32 1.0, %v1765_v23  ;;  %v477_v36 = vpop.permute.xlu0 %476 }
 0x146   : > { %v925_v0 = vpop.f32.mrb[16].mxu1  ;;  %1782 = vpow2.f32 %v1548_v14  ;;  %v1550_v24 = vmul.f32 -1.442695, %v1035_v34 }
 0x147   : > { %v926_v18 = vadd.f32 %v925_v0, %v457_v15  ;;  %v927_v19 = vpop.f32.mrb[17].mxu1  ;;  %v1767_v38 = vpop.eup %1766  ;;  %1784 = vrcp.f32 %v1104_v35 }
 0x148   : > { %v928_v22 = vadd.f32 %v927_v19, %v457_v15  ;;  %v929_v37 = vpop.f32.mrb[18].mxu1  ;;  %v1769_v43 = vpop.eup %1768  ;;  %1786 = vpow2.f32 %v1549_v17 }
 0x149   : > { %v1039_v26 = vadd.f32 %v2152_v47, %v926_v18  ;;  %v930_v27 = vadd.f32 %v929_v37, %v462_v21  ;;  %v931_v28 = vpop.f32.mrb[19].mxu1  ;;  %v1771_v30 = vpop.eup %1770  ;;  %1788 = vrcp.f32 %v1105_v20  ;;  %v1149_v47 = vadd.f32 1.0, %v1767_v38 }
 0x14a   : > { %v1041_v41 = vadd.f32 %v2154_v51, %v928_v22  ;;  %v932_v42 = vadd.f32 %v931_v28, %v462_v21  ;;  %v1773_v49 = vpop.eup %1772  ;;  %1790 = vpow2.f32 %v1550_v24  ;;  %v1150_v50 = vadd.f32 1.0, %v1769_v43  ;;  %v482_v23 = vpop.permute.xlu1 %481 }
 0x14b   : > { %v1043_v45 = vadd.f32 %v2156_v53, %v930_v27  ;;  %1792 = vrcp.f32 %v1106_v39  ;;  %v2195_v54 = vpop.eup %1774  ;;  %v1151_v51 = vadd.f32 1.0, %v1771_v30  ;;  %v1152_v53 = vadd.f32 1.0, %v1773_v49 }
 0x14c   : > { %v1045_v48 = vadd.f32 %v2158_v55, %v932_v42  ;;  %1794 = vrcp.f32 %v1107_v44  ;;  %v2197_v32 = vpop.eup %1776  ;;  %v1551_v62 = vmul.f32 -1.442695, %v1039_v26  ;;  %v1552_v6 = vmul.f32 -1.442695, %v1041_v41 }
 0x14d   : > { %1796 = vrcp.f32 %v1108_v46  ;;  %v2199_v60 = vpop.eup %1778  ;;  %v1553_v14 = vmul.f32 -1.442695, %v1043_v45 }
 0x14e   : > { %v935_v31 = vpop.f32.mrb[20].mxu1  ;;  %1798 = vrcp.f32 %v1149_v47  ;;  %v1554_v0 = vmul.f32 -1.442695, %v1045_v48 }
 0x14f   : > { %v936_v56 = vadd.f32 %v935_v31, %v467_v52  ;;  %v937_v57 = vpop.f32.mrb[21].mxu1  ;;  %v1781_v5 = vpop.eup %1780  ;;  %1800 = vrcp.f32 %v1150_v50 }
 0x150   : > { %v938_v59 = vadd.f32 %v937_v57, %v467_v52  ;;  %v939_v55 = vpop.f32.mrb[22].mxu1  ;;  %v1783_v13 = vpop.eup %1782  ;;  %1802 = vrcp.f32 %v1151_v51  ;;  %v1153_v17 = vadd.f32 1.0, %v1781_v5 }
 0x151   : > { %v1049_v63 = vadd.f32 %v2160_v4, %v936_v56  ;;  %v940_v1 = vadd.f32 %v939_v55, %v472_v58  ;;  %v941_v3 = vpop.f32.mrb[23].mxu1  ;;  %v2204_v15 = vpop.eup %1784  ;;  %1804 = vrcp.f32 %v1152_v53  ;;  %v1154_v19 = vadd.f32 1.0, %v1783_v13 }
 0x152   : > { %v1051_v9 = vadd.f32 %v2162_v8, %v938_v59  ;;  %v942_v34 = vadd.f32 %v941_v3, %v472_v58  ;;  %v1787_v4 = vpop.eup %1786  ;;  %1806 = vpow2.f32 %v1551_v62 }
 0x153   : > { %v1053_v35 = vadd.f32 %v2164_v10, %v940_v1  ;;  %v2207_v18 = vpop.eup %1788  ;;  %1808 = vpow2.f32 %v1552_v6  ;;  %v1155_v37 = vadd.f32 1.0, %v1787_v4  ;;  %v1555_v27 = vmul.f32 -1.442695, %v1049_v63 }
 0x154   : > { %v1055_v16 = vadd.f32 %v2166_v12, %v942_v34  ;;  %v1791_v20 = vpop.eup %1790  ;;  %1810 = vpow2.f32 %v1553_v14  ;;  %v1556_v30 = vmul.f32 -1.442695, %v1051_v9  ;;  %v1229_v34 = vld [vmem:[%s2232_s25] sm:$0xff] }
 0x155   : > { %v2209_v10 = vpop.eup %1792  ;;  %1812 = vpow2.f32 %v1554_v0  ;;  %v1156_v42 = vadd.f32 1.0, %v1791_v20  ;;  %v1557_v56 = vmul.f32 -1.442695, %v1053_v35  ;;  %v1231_v20 = vld [vmem:[%s2232_s25 + $0x10] sm:$0xff] }
 0x156   : > { %v945_v8 = vpop.f32.mrb[24].mxu1  ;;  %v2211_v26 = vpop.eup %1794  ;;  %1814 = vrcp.f32 %v1153_v17  ;;  %v1558_v59 = vmul.f32 -1.442695, %v1055_v16 }
 0x157   : > { %v946_v21 = vadd.f32 %v945_v8, %v477_v36  ;;  %v947_v22 = vpop.f32.mrb[25].mxu1  ;;  %v2214_v41 = vpop.eup %1796  ;;  %1816 = vrcp.f32 %v1154_v19 }
 0x158   : > { %v948_v24 = vadd.f32 %v947_v22, %v477_v36  ;;  %v949_v12 = vpop.f32.mrb[26].mxu1  ;;  %v1799_v45 = vpop.eup %1798  ;;  %v1232_v22 = vld [vmem:[%s2232_s25 + $0x18] sm:$0xff] }
 0x159   : > { %v1059_v28 = vadd.f32 %v2168_v25, %v946_v21  ;;  %v950_v38 = vadd.f32 %v949_v12, %v482_v23  ;;  %v951_v39 = vpop.f32.mrb[27].mxu1  ;;  %v2218_v48 = vpop.eup %1800  ;;  %v1233_v12 = vld [vmem:[%s2232_s25 + $0x20] sm:$0xff] }
 0x15a   : > { %v1061_v43 = vadd.f32 %v2171_v33, %v948_v24  ;;  %v952_v44 = vadd.f32 %v951_v39, %v482_v23  ;;  %v2221_v49 = vpop.eup %1802  ;;  %v487_v33 = vpop.permute.xlu0 %486 }
 0x15b   : > { %1818 = vtanh.f32 %v1059_v28  ;;  %v1063_v46 = vadd.f32 %v2174_v40, %v950_v38  ;;  %v2226_v47 = vpop.eup %1804  ;;  %v1239_v38 = vmul.f32 %v2221_v49, %v1231_v20 }
 0x15c   : > { %1820 = vrcp.f32 %v1155_v37  ;;  %v1065_v25 = vadd.f32 %v2177_v29, %v952_v44  ;;  %v1807_v52 = vpop.eup %1806  ;;  %v492_v29 = vpop.permute.xlu1 %491 }
 0x15d   : > { %1822 = vpow2.f32 %v1555_v27  ;;  %v1809_v51 = vpop.eup %1808  ;;  %v1197_v3 = vadd.f32 1.0, %v1807_v52 }
 0x15e   : > { %1824 = vrcp.f32 %v1156_v42  ;;  %v955_v50 = vpop.f32.mrb[28].mxu1  ;;  %v1811_v58 = vpop.eup %1810  ;;  %v1198_v13 = vadd.f32 1.0, %v1809_v51 }
 0x15f   : > { %1826 = vpow2.f32 %v1556_v30  ;;  %v956_v31 = vadd.f32 %v955_v50, %v487_v33  ;;  %v957_v40 = vpop.f32.mrb[29].mxu1  ;;  %v1813_v1 = vpop.eup %1812  ;;  %v1199_v19 = vadd.f32 1.0, %v1811_v58  ;;  %v1235_v50 = vld [vmem:[%s2232_s25 + $0x30] sm:$0xff] }
 0x160   : > { %1828 = vtanh.f32 %v1061_v43  ;;  %v958_v57 = vadd.f32 %v957_v40, %v487_v33  ;;  %v959_v53 = vpop.f32.mrb[30].mxu1  ;;  %v1815_v9 = vpop.eup %1814  ;;  %v1200_v21 = vadd.f32 1.0, %v1813_v1  ;;  %v1240_v43 = vmul.f32 %v2226_v47, %v1232_v22  ;;  %v1234_v47 = vld [vmem:[%s2232_s25 + $0x28] sm:$0xff] }
 0x161   : > { %1830 = vtanh.f32 %v1063_v46  ;;  %v1069_v55 = vadd.f32 %v2180_v61, %v956_v31  ;;  %v960_v62 = vadd.f32 %v959_v53, %v492_v29  ;;  %v961_v63 = vpop.f32.mrb[31].mxu1  ;;  %v2238_v35 = vpop.eup %1816 }
 0x162   : > { %1832 = vtanh.f32 %v1065_v25  ;;  %v1071_v5 = vadd.f32 %v2183_v2, %v958_v57  ;;  %v962_v6 = vadd.f32 %v961_v63, %v492_v29  ;;  %v1237_v2 = vmul.f32 %v1799_v45, %v1229_v34  ;;  %v1236_v29 = vld [vmem:[%s2232_s25 + $0x38] sm:$0xff] }
 0x163   : > { %1834 = vtanh.f32 %v1069_v55  ;;  %v1073_v14 = vadd.f32 %v2186_v7, %v960_v62  ;;  %v1242_v51 = vmul.f32 %v2238_v35, %v1234_v47 }
 0x164   : > { %1836 = vpow2.f32 %v1557_v56  ;;  %v1075_v61 = vadd.f32 %v2189_v11, %v962_v6  ;;  %v1230_v11 = vld [vmem:[%s2232_s25 + $0x8] sm:$0xff] }
 0x165   : > { %v1819_v0 = vpop.eup %1818  ;;  %1838 = vpow2.f32 %v1558_v59  ;;  %v1238_v24 = vmul.f32 %v2218_v48, %v1230_v11 }
 0x166   : > { %v2241_v16 = vpop.eup %1820  ;;  %1840 = vrcp.f32 %v1197_v3  ;;  %v1245_v4 = vmul.f32 %v1819_v0, %v2195_v54 }
 0x167   : > { %v1823_v17 = vpop.eup %1822  ;;  %1842 = vrcp.f32 %v1198_v13  ;;  %v1243_v53 = vmul.f32 %v2241_v16, %v1235_v50 }
 0x168   : > { %v2250_v7 = vpop.eup %1824  ;;  %v1253_v36 = vadd.f32 %v1245_v4, %v1237_v2  ;;  %1844 = vtanh.f32 %v1071_v5  ;;  %v1201_v37 = vadd.f32 1.0, %v1823_v17 }
 0x169   : > { %v1827_v8 = vpop.eup %1826  ;;  %1846 = vtanh.f32 %v1073_v14 }
 0x16a   : > { %v1829_v54 = vpop.eup %1828  ;;  %1848 = vtanh.f32 %v1253_v36  ;;  %1285 = vst [vmem:[%s2248_s28] sm:$0xff] %v1253_v36  ;;  %v1202_v52 = vadd.f32 1.0, %v1827_v8 }
 0x16b   : > { %v1831_v23 = vpop.eup %1830  ;;  %v1246_v27 = vmul.f32 %v1829_v54, %v2197_v32  ;;  %1850 = vtanh.f32 %v1075_v61  ;;  %v1241_v32 = vmul.f32 %v1815_v9, %v1233_v12 }
 0x16c   : > { %v1833_v28 = vpop.eup %1832  ;;  %1852 = vrcp.f32 %v1199_v19  ;;  %v1247_v39 = vmul.f32 %v1831_v23, %v2199_v60 }
 0x16d   : > { %v1835_v42 = vpop.eup %1834  ;;  %1854 = vrcp.f32 %v1200_v21  ;;  %v1254_v44 = vadd.f32 %v1246_v27, %v1238_v24  ;;  %v1248_v45 = vmul.f32 %v1833_v28, %v2204_v15 }
 0x16e   : > { %v1837_v30 = vpop.eup %1836  ;;  %1856 = vrcp.f32 %v1201_v37  ;;  %v1255_v46 = vadd.f32 %v1247_v39, %v1239_v38  ;;  %v1249_v48 = vmul.f32 %v1835_v42, %v2207_v18 }
 0x16f   : > { %v1839_v25 = vpop.eup %1838  ;;  %1858 = vtanh.f32 %v1254_v44  ;;  %1286 = vst [vmem:[%s2248_s28 + $0x8] sm:$0xff] %v1254_v44  ;;  %v1256_v60 = vadd.f32 %v1248_v45, %v1240_v43  ;;  %v1203_v40 = vadd.f32 1.0, %v1837_v30 }
 0x170   : > { %v1841_v49 = vpop.eup %1840  ;;  %1860 = vtanh.f32 %v1255_v46  ;;  %1287 = vst [vmem:[%s2248_s28 + $0x10] sm:$0xff] %v1255_v46  ;;  %v1257_v33 = vadd.f32 %v1249_v48, %v1241_v32  ;;  %v1204_v55 = vadd.f32 1.0, %v1839_v25 }
 0x171   : > { %v1843_v15 = vpop.eup %1842  ;;  %1862 = vtanh.f32 %v1256_v60  ;;  %1288 = vst [vmem:[%s2248_s28 + $0x18] sm:$0xff] %v1256_v60 }
 0x172   : > { %v1845_v31 = vpop.eup %1844  ;;  %1864 = vtanh.f32 %v1257_v33  ;;  %1289 = vst [vmem:[%s2248_s28 + $0x20] sm:$0xff] %v1257_v33 }
 0x173   : > { %v1847_v18 = vpop.eup %1846  ;;  %v1250_v56 = vmul.f32 %v1845_v31, %v2209_v10  ;;  %1866 = vrcp.f32 %v1202_v52  ;;  %v1244_v10 = vmul.f32 %v2250_v7, %v1236_v29 }
 0x174   : > { %v1849_v57 = vpop.eup %1848  ;;  %v1251_v58 = vmul.f32 %v1847_v18, %v2211_v26  ;;  %1868 = vrcp.f32 %v1203_v40 }
 0x175   : > { %v1851_v59 = vpop.eup %1850  ;;  %v1269_v62 = vmul.f32 %v1849_v57, %v1841_v49  ;;  %v1258_v63 = vadd.f32 %v1250_v56, %v1242_v51 }
 0x176   : > { %v1853_v1 = vpop.eup %1852  ;;  %v1259_v3 = vadd.f32 %v1251_v58, %v1243_v53  ;;  %v1252_v5 = vmul.f32 %v1851_v59, %v2214_v41 }
 0x177   : > { %v1855_v6 = vpop.eup %1854  ;;  %1277 = vst [vmem:[%s2278_s6] sm:$0xff] %v1269_v62  ;;  %1870 = vtanh.f32 %v1258_v63  ;;  %1290 = vst [vmem:[%s2248_s28 + $0x28] sm:$0xff] %v1258_v63 }
 0x178   : > { %v1857_v26 = vpop.eup %1856  ;;  %1872 = vtanh.f32 %v1259_v3  ;;  %1291 = vst [vmem:[%s2248_s28 + $0x30] sm:$0xff] %v1259_v3  ;;  %v1260_v9 = vadd.f32 %v1252_v5, %v1244_v10 }
 0x179   : > { %v1859_v34 = vpop.eup %1858  ;;  %1874 = vrcp.f32 %v1204_v55 }
 0x17a   : > { %v1861_v13 = vpop.eup %1860  ;;  %v1270_v14 = vmul.f32 %v1859_v34, %v1843_v15  ;;  %1876 = vtanh.f32 %v1260_v9  ;;  %1292 = vst [vmem:[%s2248_s28 + $0x38] sm:$0xff] %v1260_v9 }
 0x17b   : > { %v1863_v35 = vpop.eup %1862  ;;  %v1271_v41 = vmul.f32 %v1861_v13, %v1853_v1 }
 0x17c   : > { %v1865_v61 = vpop.eup %1864  ;;  %1278 = vst [vmem:[%s2278_s6 + $0x8] sm:$0xff] %v1270_v14  ;;  %v1272_v0 = vmul.f32 %v1863_v35, %v1855_v6 }
 0x17d   : > { %1279 = vst [vmem:[%s2278_s6 + $0x10] sm:$0xff] %v1271_v41  ;;  %v1273_v16 = vmul.f32 %v1865_v61, %v1857_v26  ;;  %v1867_v2 = vpop.eup %1866 }
 0x17e   : > { %1280 = vst [vmem:[%s2278_s6 + $0x18] sm:$0xff] %v1272_v0  ;;  %v1869_v4 = vpop.eup %1868 }
 0x17f   : > { %1281 = vst [vmem:[%s2278_s6 + $0x20] sm:$0xff] %v1273_v16 }
 0x181   : > { %v1871_v17 = vpop.eup %1870 }
 0x182   : > { %v1873_v7 = vpop.eup %1872  ;;  %v1274_v11 = vmul.f32 %v1871_v17, %v1867_v2 }
 0x183   : > { %v1875_v19 = vpop.eup %1874  ;;  %v1275_v36 = vmul.f32 %v1873_v7, %v1869_v4 }
 0x184   : > { %v1877_v8 = vpop.eup %1876  ;;  %1282 = vst [vmem:[%s2278_s6 + $0x28] sm:$0xff] %v1274_v11 }
 0x185   : > { %1283 = vst [vmem:[%s2278_s6 + $0x30] sm:$0xff] %v1275_v36  ;;  %v1276_v20 = vmul.f32 %v1877_v8, %v1875_v19 }
 0x187   : > { %1284 = vst [vmem:[%s2278_s6 + $0x38] sm:$0xff] %v1276_v20 }
 0x188 PF: > { %s16_s20 = sadd.s32 1, %s1900_s20   ;;  %s2309_s18 = smov %s1896_s19 }
 0x189   : > { %p13_p5 = scmp.ge.s32.totalorder %s16_s20, 4   ;;  %s2310_s19 = smov %s2312_s21 }
 0x18b   :  { %15 = sbr.rel (!%p13_p5) target bundleno = 2 (0x2), region = 81 }

</bundles_post_ra>
